<compile_context>
chip_gen: v6e
topology: v6e:2x2x1
jax: 0.10.0
libtpu: 0.0.40
codegen_flags: <defaults>
</compile_context>

<pallas_src>
import functools

import jax
import jax.numpy as jnp
from jax.experimental import pallas as pl
from jax.experimental.pallas import tpu as pltpu

MIN_FREQ = 1e-4

# ---- module-consistent config ---------------------------------------------
NUM_FREQS = 16            # PositionalNet.num_freqs_for_sinusoidal
N_POS_OBS = 5             # fixed in the module
N_OUT_FEATS = 32          # patch_hwCh[2] == MemoryNet.Transformer.input_size
PATCH_H = 4               # patch_hwCh[0]
PATCH_W = 4               # patch_hwCh[1]
BATCH = 8

ENC_DIM = NUM_FREQS * N_POS_OBS          # 80   (logical encoding width)
ENC_PAD = 128                            # encoding width padded to a lane tile
K_IN = 8                                 # pos obs padded to a full sublane tile
OUT_LANES = N_OUT_FEATS * PATCH_H * PATCH_W   # 512 (lane-dense output width)
CONST_ROWS = K_IN + ENC_PAD              # 136


def _positional_kernel(pos_ref, consts_ref, out_ref):
    """Sinusoidal encoding + (projection x 4x4 repeat) for one batch tile.

    pos_ref    : (bb, 8)     f32 VMEM  cols 0:5 = positional_obs, col 5 = 1.0
    consts_ref : (136, 512)  f32 VMEM  rows 0:5,  lanes 0:80  = block-diag freqs
                                       row  5,    lanes 0:80  = phase (pi/2 / 0)
                                       rows 8:88, lanes 0:512 = w_rep (80, 512)
                                       rows 88:136             = 0 (K padding)
    out_ref    : (bb, 512)   f32 VMEM  lane c*16 + h*4 + w == out[b, c, h, w]
    """
    pos_aug = pos_ref[...]                                   # (bb, 8)
    f_aug = consts_ref[0:K_IN, 0:ENC_PAD]                    # (8, 128)
    w_rep = consts_ref[K_IN:CONST_ROWS, :]                   # (128, 512)

    # One MXU pass computes pos * freqs (block-diag) AND adds the cos/sin phase
    # (row 5 x the 1.0 column of pos_aug).  cos(x) == sin(x + pi/2).
    x = jnp.dot(pos_aug, f_aug, preferred_element_type=jnp.float32)   # (bb, 128)
    enc = jnp.sin(x)                                                  # single EUP op

    # Projection with the 4x4 spatial repeat folded into the weight columns:
    # lane-dense (multiple-of-128) store, no masked vst, no post-kernel broadcast.
    out_ref[...] = jnp.dot(enc, w_rep, preferred_element_type=jnp.float32)


def _round_up(x, m):
    return ((x + m - 1) // m) * m


def _pick_batch_tile(b, block_b, min_steps=4, min_tile=256):
    """Sublane-aligned batch tile.

    Small batches -> one grid step (per-step overhead ~0.35us dominates).
    Large batches -> at least `min_steps` steps so the ("parallel",) axis can
    shard across both v7x TensorCores and DMA overlaps compute, with tiles of
    at least `min_tile` rows for good HBM DMA efficiency.
    """
    b8 = _round_up(max(b, 1), 8)
    bb = min(_round_up(block_b, 8), b8)
    if pl.cdiv(b8, bb) < min_steps and b8 >= 2 * min_tile:
        bb = max(min_tile, _round_up(pl.cdiv(b8, min_steps), 8))
    return bb


@functools.partial(jax.jit, static_argnames=("block_b",))
def positional_net_forward(positional_obs, consts, block_b=1024):
    """positional_obs: (B, 5) f32; consts: (136, 512) f32 (see make_params).

    Returns (B, C, 4, 4) f32, same NCHW layout/semantics as the PyTorch module.
    """
    b = positional_obs.shape[0]
    bb = _pick_batch_tile(b, block_b)
    padded_b = _round_up(b, bb)

    # (B, 5) -> (padded_b, 8): col 5 = 1.0 folds the phase row into the encoding
    # matmul; cols 6,7 = 0 give a clean K=8 sublane tile.
    pos_aug = jnp.concatenate(
        [positional_obs.astype(jnp.float32),
         jnp.ones((b, 1), jnp.float32),
         jnp.zeros((b, 2), jnp.float32)], axis=-1)
    if padded_b != b:
        pos_aug = jnp.pad(pos_aug, ((0, padded_b - b), (0, 0)))

    out_flat = pl.pallas_call(
        _positional_kernel,
        out_shape=jax.ShapeDtypeStruct((padded_b, OUT_LANES), jnp.float32),
        grid_spec=pltpu.PrefetchScalarGridSpec(
            num_scalar_prefetch=0,
            grid=(padded_b // bb,),
            in_specs=[
                pl.BlockSpec((bb, K_IN), lambda i: (i, 0)),
                # Constants: same block every step -> stays VMEM-resident.
                pl.BlockSpec((CONST_ROWS, OUT_LANES), lambda i: (0, 0)),
            ],
            out_specs=pl.BlockSpec((bb, OUT_LANES), lambda i: (i, 0)),
        ),
        compiler_params=pltpu.CompilerParams(
            dimension_semantics=("parallel",)),
    )(pos_aug, consts)

    # (B, 512) row-major is bit-identical to (B, C, 4, 4) because each output
    # channel was replicated 16x contiguously in w_rep -> zero-cost reshape.
    return out_flat[:b].reshape(b, N_OUT_FEATS, PATCH_H, PATCH_W)


def make_params():
    """Deterministic parameter / constant construction (no checkpoint load)."""
    # freqs[k] = MIN_FREQ ** (2 * (k // 2) / NUM_FREQS)
    k = jnp.arange(NUM_FREQS, dtype=jnp.float32)
    freqs = MIN_FREQ ** (2.0 * jnp.floor(k / 2.0) / NUM_FREQS)        # (16,)

    # Augmented encoding matrix (8, 128):
    #   rows 0:5 -> block-diag freqs: F[i, i*16 + j] = freqs[j]
    #   row  5   -> phase: pi/2 on even lanes (-> cos), 0 on odd lanes (-> sin)
    #   rows 6:7 and lanes 80:128 -> zero padding
    f_aug = jnp.zeros((K_IN, ENC_PAD), dtype=jnp.float32)
    for i in range(N_POS_OBS):
        f_aug = f_aug.at[i, i * NUM_FREQS:(i + 1) * NUM_FREQS].set(freqs)
    lane = jnp.arange(ENC_DIM)
    phase = jnp.where((lane % 2) == 0,
                      jnp.float32(jnp.pi / 2.0), jnp.float32(0.0))
    f_aug = f_aug.at[N_POS_OBS, 0:ENC_DIM].set(phase)

    # torch nn.Linear default init: U(-1/sqrt(fan_in), 1/sqrt(fan_in)), no bias.
    bound = float(ENC_DIM) ** -0.5
    w = jax.random.uniform(jax.random.PRNGKey(0),
                           (N_OUT_FEATS, ENC_DIM),
                           minval=-bound, maxval=bound,
                           dtype=jnp.float32)                         # (32, 80)

    # Replicated projection weight (128, 512): column c*16 + hw holds w[c, :],
    # i.e. the 4x4 spatial repeat folded into the linear layer; rows 80:128 are
    # zero so the padded encoding lanes never reach the output.
    w_rep = jnp.repeat(w.T, PATCH_H * PATCH_W, axis=1)                # (80, 512)
    w_rep = jnp.pad(w_rep, ((0, ENC_PAD - ENC_DIM), (0, 0)))          # (128, 512)

    # Pack everything into a single operand (one HBM->VMEM DMA, VMEM-resident).
    consts = jnp.zeros((CONST_ROWS, OUT_LANES), dtype=jnp.float32)
    consts = consts.at[0:K_IN, 0:ENC_PAD].set(f_aug)
    consts = consts.at[K_IN:CONST_ROWS, :].set(w_rep)
    return consts, freqs, w


def reference_forward(positional_obs, freqs, w,
                      patch_h=PATCH_H, patch_w=PATCH_W):
    """Pure-JAX reference mirroring the PyTorch forward (true cos/sin select)."""
    lane = jnp.arange(NUM_FREQS)
    even = (lane % 2) == 0
    parts = []
    for idx in range(N_POS_OBS):
        x = positional_obs[:, idx:idx + 1] * freqs[None, :]
        parts.append(jnp.where(even[None, :], jnp.cos(x), jnp.sin(x)))
    enc = jnp.concatenate(parts, axis=-1)                             # (B, 80)
    out = jnp.dot(enc, w.T, precision=jax.lax.Precision.HIGHEST)      # (B, 32)
    return jnp.broadcast_to(out[:, :, None, None],
                            (out.shape[0], out.shape[1], patch_h, patch_w))


if __name__ == "__main__":
    consts, freqs, w = make_params()

    # Small, module-consistent batch (note: at B=8 the fixed launch/DMA cost
    # dominates; in production fuse/batch this op with neighbouring work).
    pos_obs = jax.random.normal(jax.random.PRNGKey(0),
                                (BATCH, N_POS_OBS), dtype=jnp.float32)
    out = jax.block_until_ready(positional_net_forward(pos_obs, consts))
    assert out.shape == (BATCH, N_OUT_FEATS, PATCH_H, PATCH_W), out.shape
    ref = reference_forward(pos_obs, freqs, w)
    # 1e-4: headroom for the cos(x)=sin(x+pi/2) rewrite and MXU f32-emulation
    # rounding differences vs. the XLA HIGHEST-precision reference matmul.
    assert jnp.allclose(out, ref, atol=1e-4, rtol=1e-4), \
        float(jnp.max(jnp.abs(out - ref)))

    # Larger non-tile-multiple batch: exercises padding, the multi-step
    # ("parallel",) grid (megacore on v7x) and the lane-dense (bb, 512) store.
    big_b = 1040
    pos_big = jax.random.normal(jax.random.PRNGKey(1),
                                (big_b, N_POS_OBS), dtype=jnp.float32)
    out_big = jax.block_until_ready(positional_net_forward(pos_big, consts))
    assert out_big.shape == (big_b, N_OUT_FEATS, PATCH_H, PATCH_W)
    ref_big = reference_forward(pos_big, freqs, w)
    assert jnp.allclose(out_big, ref_big, atol=1e-4, rtol=1e-4), \
        float(jnp.max(jnp.abs(out_big - ref_big)))

    print("KERNEL_OK")
</pallas_src>

<mosaic_0001>
module attributes {stable_mosaic.version = 11 : i64} {
  func.func @_positional_kernel(%arg0: i32, %arg1: memref<8x8xf32, #tpu.memory_space<vmem>>, %arg2: memref<136x512xf32, #tpu.memory_space<vmem>>, %arg3: memref<8x512xf32, #tpu.memory_space<vmem>>) attributes {dimension_semantics = [#tpu.dimension_semantics<parallel>], iteration_bounds = array<i64: 1>, scalar_prefetch = 0 : i64, scratch_operands = 0 : i64, tpu.core_type = #tpu.core_type<tc>, window_params = [{transform_indices = @transform_0, window_bounds = array<i64: 8, 8>}, {pipeline_mode = #tpu.pipeline_mode<synchronous>, transform_indices = @transform_1, window_bounds = array<i64: 136, 512>}, {transform_indices = @transform_2, window_bounds = array<i64: 8, 512>}]} {
    %c0 = arith.constant 0 : index
    %c0_0 = arith.constant 0 : index
    %0 = vector.load %arg1[%c0, %c0_0] : memref<8x8xf32, #tpu.memory_space<vmem>>, vector<8x8xf32>
    %c0_1 = arith.constant 0 : index
    %c0_2 = arith.constant 0 : index
    %1 = vector.load %arg2[%c0_1, %c0_2] : memref<136x512xf32, #tpu.memory_space<vmem>>, vector<8x128xf32>
    %c8 = arith.constant 8 : index
    %c0_3 = arith.constant 0 : index
    %2 = vector.load %arg2[%c8, %c0_3] : memref<136x512xf32, #tpu.memory_space<vmem>>, vector<128x512xf32>
    %cst = arith.constant dense<0.000000e+00> : vector<8x128xf32>
    %3 = tpu.matmul %0, %1, %cst {dimension_numbers = #tpu.dot_dimension_numbers<[1], [0], [0], [1], [0, 0, 1, 1], [], []>} : vector<8x8xf32>, vector<8x128xf32>, vector<8x128xf32> -> vector<8x128xf32>
    %4 = math.sin %3 : vector<8x128xf32>
    %cst_4 = arith.constant dense<0.000000e+00> : vector<8x512xf32>
    %5 = tpu.matmul %4, %2, %cst_4 {dimension_numbers = #tpu.dot_dimension_numbers<[1], [0], [0], [1], [0, 0, 1, 1], [], []>} : vector<8x128xf32>, vector<128x512xf32>, vector<8x512xf32> -> vector<8x512xf32>
    %c0_5 = arith.constant 0 : index
    %c0_6 = arith.constant 0 : index
    %6 = vector.load %arg3[%c0_5, %c0_6] : memref<8x512xf32, #tpu.memory_space<vmem>>, vector<8x512xf32>
    tpu.vector_store %arg3[%c0_5, %c0_6], %5 {strides = array<i32>} : memref<8x512xf32, #tpu.memory_space<vmem>>, vector<8x512xf32>,
    return
  }
  func.func @transform_0(%arg0: i32) -> (i32, i32) {
    %c0_i32 = arith.constant 0 : i32
    %c0_i32_0 = arith.constant 0 : i32
    return %arg0, %c0_i32 : i32, i32
  }
  func.func @transform_1(%arg0: i32) -> (i32, i32) {
    %c0_i32 = arith.constant 0 : i32
    %c0_i32_0 = arith.constant 0 : i32
    %c0_i32_1 = arith.constant 0 : i32
    return %c0_i32, %c0_i32_0 : i32, i32
  }
  func.func @transform_2(%arg0: i32) -> (i32, i32) {
    %c0_i32 = arith.constant 0 : i32
    %c0_i32_0 = arith.constant 0 : i32
    return %arg0, %c0_i32 : i32, i32
  }
}

</mosaic_0001>

<bundles_post_ra>
// kernel: positional_net_forward.1
= control target key start
LH: loop header
LB: loop body
LE: loop exit
PB: predicated region body
PF: predicated region fallthrough
CT: control target
= control target key end

     0   :  { %7 = vsyncpa [#allocation3], 0  ;;  %s473_s9 = smov [#allocation2]   ;;  %s538_s0 = inlined_call_operand.vmem [shape: f32[8,8], index: 0, kind: input, shape index: {}]   ;;  %s539_s1 = inlined_call_operand.hbm [shape: f32[136,512], index: 1, kind: input, shape index: {}]   ;;  %s540_s2 = inlined_call_operand.vmem [shape: f32[8,512], index: 2, kind: output, shape index: {}]  }
   0x1   :  { %s15_s10 = sshll.u32 %s473_s9, 4  ;;  %s16_s10 = int_to_ptr.vmem [resolvable:$true] %s15_s10 }
   0x2   :  { %s459_s11 = scalar_lea.vmem %s16_s10, 8704  ;;  %p464_p1 = scmp.lt.s32.totalorder %s16_s10, %s16_s10 }
   0x3   :  { %p460_p0 = scmp.ne.s32.totalorder %s16_s10, %s459_s11  ;;  %p465_p2 = scmp.lt.s32.totalorder %s459_s11, %s459_s11 }
   0x5   :  { %p466_p3 = por %p465_p2, %p464_p1 }
   0x7   :  { %p467_p4 = pnand %p466_p3, %p460_p0 }
   0x9   :  { %470 = shalt.err (!%p467_p4)
}
   0xa   :  { %s474_s12 = smov 512   ;;  %s475_s13 = smov 32  }
   0xb   :  { %21 = dma.hbm_to_vmem [thread:$0]  %s539_s1, 8704, %s16_s10, [#allocation3], %s474_s12, %s474_s12, %s475_s13  }
   0xc   :  { %471 = dma.done.wait [#allocation3], 8704  }
   0xd   :  { %472 = vsyncadd [#allocation3], 4294958592  ;;  %v476_v0 = vmov 0.0   ;;  %vm477_vm0 = vmmov 0   ;;  %vm91_vm1 = vcmask 64512   ;;  %v26_v1 = vld [vmem:[#allocation2] sm:$0xff] }
   0xe   :  { %427 = vmatprep.subr.mxu0 %v476_v0  ;;  %429 = vmatprep.mubr.msk.f32.mxu0 %vm477_vm0, %v476_v0  ;;  %v25_v2 = vld [vmem:[%s538_s0] sm:$0xff]  ;;  %v88_v3 = vld [vmem:[#allocation2 + $0x208] sm:$0xff]  ;;  %v90_v4 = vld [vmem:[#allocation2 + $0x218] sm:$0xff] }
   0xf   :  { %333 = vmatprep.mubr.f32.mxu1 %v476_v0  ;;  %428 = vmatpush3.msra.mxu0 %v26_v1  ;;  %v87_v5 = vld [vmem:[#allocation2 + $0x200] sm:$0xff]  ;;  %v89_v6 = vld [vmem:[#allocation2 + $0x210] sm:$0xff]  ;;  %v84_v7 = vld [vmem:[#allocation2 + $0x1e8] sm:$0xff] }
  0x10   :  { %430 = vmatmul.mubr.msk.f32.vlgmr.msra.gmra.mxu0 %vm91_vm1, %v25_v2  ;;  %269 = vmatprep.subr.mxu1 %v88_v3  ;;  %v86_v8 = vld [vmem:[#allocation2 + $0x1f8] sm:$0xff]  ;;  %v83_v9 = vld [vmem:[#allocation2 + $0x1e0] sm:$0xff]  ;;  %v85_v10 = vld [vmem:[#allocation2 + $0x1f0] sm:$0xff] }
  0x11   :  { %404 = vmatprep.mubr.f32.mxu0 %v476_v0  ;;  %340 = vmatprep.subr.mxu0 %v90_v4  ;;  %v80_v11 = vld [vmem:[#allocation2 + $0x1c8] sm:$0xff]  ;;  %v82_v12 = vld [vmem:[#allocation2 + $0x1d8] sm:$0xff]  ;;  %v79_v13 = vld [vmem:[#allocation2 + $0x1c0] sm:$0xff] }
  0x12   :  { %270 = vmatpush1.msra.mxu1 %v87_v5  ;;  %341 = vmatpush1.msra.mxu0 %v89_v6  ;;  %v81_v14 = vld [vmem:[#allocation2 + $0x1d0] sm:$0xff]  ;;  %v76_v15 = vld [vmem:[#allocation2 + $0x1a8] sm:$0xff]  ;;  %v78_v16 = vld [vmem:[#allocation2 + $0x1b8] sm:$0xff] }
  0x13   :  { %271 = vmatprep.subr.mxu1 %v84_v7  ;;  %342 = vmatprep.subr.mxu0 %v86_v8  ;;  %v75_v17 = vld [vmem:[#allocation2 + $0x1a0] sm:$0xff]  ;;  %v77_v18 = vld [vmem:[#allocation2 + $0x1b0] sm:$0xff]  ;;  %v72_v19 = vld [vmem:[#allocation2 + $0x188] sm:$0xff] }
  0x14   :  { %272 = vmatpush1.msra.mxu1 %v83_v9  ;;  %343 = vmatpush1.msra.mxu0 %v85_v10  ;;  %v74_v20 = vld [vmem:[#allocation2 + $0x198] sm:$0xff]  ;;  %v71_v21 = vld [vmem:[#allocation2 + $0x180] sm:$0xff]  ;;  %v73_v22 = vld [vmem:[#allocation2 + $0x190] sm:$0xff] }
  0x15   :  { %273 = vmatprep.subr.mxu1 %v80_v11  ;;  %344 = vmatprep.subr.mxu0 %v82_v12  ;;  %v68_v23 = vld [vmem:[#allocation2 + $0x168] sm:$0xff]  ;;  %v70_v24 = vld [vmem:[#allocation2 + $0x178] sm:$0xff]  ;;  %v67_v25 = vld [vmem:[#allocation2 + $0x160] sm:$0xff] }
  0x16   :  { %274 = vmatpush1.msra.mxu1 %v79_v13  ;;  %345 = vmatpush1.msra.mxu0 %v81_v14  ;;  %v69_v26 = vld [vmem:[#allocation2 + $0x170] sm:$0xff]  ;;  %v64_v27 = vld [vmem:[#allocation2 + $0x148] sm:$0xff]  ;;  %v66_v28 = vld [vmem:[#allocation2 + $0x158] sm:$0xff] }
  0x17   :  { %275 = vmatprep.subr.mxu1 %v76_v15  ;;  %346 = vmatprep.subr.mxu0 %v78_v16  ;;  %v63_v29 = vld [vmem:[#allocation2 + $0x140] sm:$0xff]  ;;  %v65_v30 = vld [vmem:[#allocation2 + $0x150] sm:$0xff]  ;;  %v60_v31 = vld [vmem:[#allocation2 + $0x128] sm:$0xff]  ;;  %v478_v15 = vmov 683565275  }
  0x18   :  { %276 = vmatpush1.msra.mxu1 %v75_v17  ;;  %347 = vmatpush1.msra.mxu0 %v77_v18  ;;  %v62_v32 = vld [vmem:[#allocation2 + $0x138] sm:$0xff]  ;;  %v59_v33 = vld [vmem:[#allocation2 + $0x120] sm:$0xff]  ;;  %v61_v34 = vld [vmem:[#allocation2 + $0x130] sm:$0xff]  ;;  %v479_v17 = vmov 2475754826  }
  0x19   :  { %277 = vmatprep.subr.mxu1 %v72_v19  ;;  %348 = vmatprep.subr.mxu0 %v74_v20  ;;  %v56_v35 = vld [vmem:[#allocation2 + $0x108] sm:$0xff]  ;;  %v58_v36 = vld [vmem:[#allocation2 + $0x118] sm:$0xff]  ;;  %v55_v37 = vld [vmem:[#allocation2 + $0x100] sm:$0xff]  ;;  %v480_v20 = vmov 2131351028  }
  0x1a   :  { %278 = vmatpush1.msra.mxu1 %v71_v21  ;;  %349 = vmatpush1.msra.mxu0 %v73_v22  ;;  %v57_v38 = vld [vmem:[#allocation2 + $0x110] sm:$0xff]  ;;  %v52_v39 = vld [vmem:[#allocation2 + $0xe8] sm:$0xff]  ;;  %v54_v40 = vld [vmem:[#allocation2 + $0xf8] sm:$0xff] }
  0x1b   :  { %279 = vmatprep.subr.mxu1 %v68_v23  ;;  %350 = vmatprep.subr.mxu0 %v70_v24  ;;  %v51_v41 = vld [vmem:[#allocation2 + $0xe0] sm:$0xff]  ;;  %v53_v42 = vld [vmem:[#allocation2 + $0xf0] sm:$0xff]  ;;  %v48_v43 = vld [vmem:[#allocation2 + $0xc8] sm:$0xff]  ;;  %v481_v23 = vmov 2102212464  }
  0x1c   :  { %280 = vmatpush1.msra.mxu1 %v67_v25  ;;  %351 = vmatpush1.msra.mxu0 %v69_v26  ;;  %v50_v44 = vld [vmem:[#allocation2 + $0xd8] sm:$0xff]  ;;  %v47_v45 = vld [vmem:[#allocation2 + $0xc0] sm:$0xff]  ;;  %v49_v46 = vld [vmem:[#allocation2 + $0xd0] sm:$0xff]  ;;  %v482_v26 = vmov 920167782  }
  0x1d   :  { %281 = vmatprep.subr.mxu1 %v64_v27  ;;  %352 = vmatprep.subr.mxu0 %v66_v28  ;;  %v44_v47 = vld [vmem:[#allocation2 + $0xa8] sm:$0xff]  ;;  %v46_v48 = vld [vmem:[#allocation2 + $0xb8] sm:$0xff]  ;;  %v43_v49 = vld [vmem:[#allocation2 + $0xa0] sm:$0xff] }
  0x1e   :  { %282 = vmatpush1.msra.mxu1 %v63_v29  ;;  %353 = vmatpush1.msra.mxu0 %v65_v30  ;;  %v45_v50 = vld [vmem:[#allocation2 + $0xb0] sm:$0xff]  ;;  %v40_v51 = vld [vmem:[#allocation2 + $0x88] sm:$0xff]  ;;  %v42_v52 = vld [vmem:[#allocation2 + $0x98] sm:$0xff]  ;;  %v483_v29 = vmov 1326507024  }
  0x1f   :  { %283 = vmatprep.subr.mxu1 %v60_v31  ;;  %354 = vmatprep.subr.mxu0 %v62_v32  ;;  %v39_v53 = vld [vmem:[#allocation2 + $0x80] sm:$0xff]  ;;  %v41_v54 = vld [vmem:[#allocation2 + $0x90] sm:$0xff]  ;;  %v36_v55 = vld [vmem:[#allocation2 + $0x68] sm:$0xff] }
  0x20   :  { %284 = vmatpush1.msra.mxu1 %v59_v33  ;;  %355 = vmatpush1.msra.mxu0 %v61_v34  ;;  %v38_v56 = vld [vmem:[#allocation2 + $0x78] sm:$0xff]  ;;  %v35_v57 = vld [vmem:[#allocation2 + $0x60] sm:$0xff]  ;;  %v37_v58 = vld [vmem:[#allocation2 + $0x70] sm:$0xff] }
  0x21   :  { %285 = vmatprep.subr.mxu1 %v56_v35  ;;  %356 = vmatprep.subr.mxu0 %v58_v36  ;;  %v32_v59 = vld [vmem:[#allocation2 + $0x48] sm:$0xff]  ;;  %v34_v60 = vld [vmem:[#allocation2 + $0x58] sm:$0xff]  ;;  %v31_v61 = vld [vmem:[#allocation2 + $0x40] sm:$0xff] }
  0x22   :  { %286 = vmatpush1.msra.mxu1 %v55_v37  ;;  %357 = vmatpush1.msra.mxu0 %v57_v38  ;;  %v33_v62 = vld [vmem:[#allocation2 + $0x50] sm:$0xff]  ;;  %v28_v63 = vld [vmem:[#allocation2 + $0x28] sm:$0xff]  ;;  %v30_v0 = vld [vmem:[#allocation2 + $0x38] sm:$0xff] }
  0x23   :  { %287 = vmatprep.subr.mxu1 %v52_v39  ;;  %358 = vmatprep.subr.mxu0 %v54_v40  ;;  %v27_v1 = vld [vmem:[#allocation2 + $0x20] sm:$0xff]  ;;  %v29_v2 = vld [vmem:[#allocation2 + $0x30] sm:$0xff] }
  0x24   :  { %288 = vmatpush1.msra.mxu1 %v51_v41  ;;  %359 = vmatpush1.msra.mxu0 %v53_v42 }
  0x25   :  { %289 = vmatprep.subr.mxu1 %v48_v43  ;;  %360 = vmatprep.subr.mxu0 %v50_v44 }
  0x26   :  { %290 = vmatpush1.msra.mxu1 %v47_v45  ;;  %361 = vmatpush1.msra.mxu0 %v49_v46 }
  0x27   :  { %291 = vmatprep.subr.mxu1 %v44_v47  ;;  %362 = vmatprep.subr.mxu0 %v46_v48 }
  0x28   :  { %292 = vmatpush1.msra.mxu1 %v43_v49  ;;  %363 = vmatpush1.msra.mxu0 %v45_v50 }
  0x29   :  { %293 = vmatprep.subr.mxu1 %v40_v51  ;;  %364 = vmatprep.subr.mxu0 %v42_v52 }
  0x2a   :  { %294 = vmatpush1.msra.mxu1 %v39_v53  ;;  %365 = vmatpush1.msra.mxu0 %v41_v54 }
  0x2b   :  { %295 = vmatprep.subr.mxu1 %v36_v55  ;;  %366 = vmatprep.subr.mxu0 %v38_v56 }
  0x2c   :  { %296 = vmatpush1.msra.mxu1 %v35_v57  ;;  %367 = vmatpush1.msra.mxu0 %v37_v58 }
  0x2d   :  { %297 = vmatprep.subr.mxu1 %v32_v59  ;;  %368 = vmatprep.subr.mxu0 %v34_v60 }
  0x2e   :  { %298 = vmatpush1.msra.mxu1 %v31_v61  ;;  %369 = vmatpush1.msra.mxu0 %v33_v62 }
  0x2f   :  { %299 = vmatprep.subr.mxu1 %v28_v63  ;;  %370 = vmatprep.subr.mxu0 %v30_v0 }
  0x30   :  { %300 = vmatpush1.msra.mxu1 %v27_v1  ;;  %371 = vmatpush1.msra.mxu0 %v29_v2 }
  0xd0   :  { %v505_v3 = vpop.f32.mrf.mxu0 }
  0xd1   :  { %v168_v4 = vand.u32 2139095040, %v505_v3  ;;  %v165_v9 = vand.u32 2147483647, %v505_v3  ;;  %vm167_vm9 = vcmp.lt.s32.totalorder %v505_v3, 0  ;;  %vm257_vm14 = vweird.f32 %v505_v3 }
  0xd2   :  { %v431_v5 = vpop.f32.mrf.mxu0 }
  0xd3   :  { %v169_v6 = vshrl.u32 %v168_v4, 23  ;;  %v172_v12 = vand.u32 8388607, %v165_v9  ;;  %vm166_vm10 = vcmp.le.f32.partialorder %v165_v9, 0.7853982 }
  0xd5   :  { %v421_v7 = vadd.s32 4294967169, %v169_v6  ;;  %v173_v31 = vor.u32 8388608, %v172_v12 }
  0xd7   :  { %v175_v8 = vadd.s32 1, %v421_v7  ;;  %v213_v45 = vshll.u32 %v173_v31, 8 }
  0xd9   :  { %vm176_vm2 = vcmp.gt.s32.totalorder %v175_v8, 0 }
  0xda   :  { %v177_v10 = vsel %vm176_vm2, %v175_v8, 0 }
  0xdb   :  { %v179_v11 = vand.u32 31, %v177_v10  ;;  %v178_v14 = vshrl.u32 %v177_v10, 5 }
  0xdd   :  { %v180_v13 = vsub.s32 32, %v179_v11  ;;  %v182_v16 = vshll.u32 %v478_v15, %v179_v11  ;;  %v185_v18 = vshll.u32 %v479_v17, %v179_v11  ;;  %v188_v22 = vshll.u32 %v480_v20, %v179_v11 }
  0xde   :  { %v191_v25 = vshll.u32 %v481_v23, %v179_v11  ;;  %v194_v28 = vshll.u32 %v482_v26, %v179_v11  ;;  %vm197_vm3 = vcmp.lt.s32.totalorder %v178_v14, 1  ;;  %vm200_vm4 = vcmp.lt.s32.totalorder %v178_v14, 4 }
  0xdf   :  { %v183_v19 = vshrl.u32 %v479_v17, %v180_v13  ;;  %v186_v21 = vshrl.u32 %v480_v20, %v180_v13  ;;  %v189_v24 = vshrl.u32 %v481_v23, %v180_v13  ;;  %v192_v27 = vshrl.u32 %v482_v26, %v180_v13 }
  0xe0   :  { %v195_v30 = vshrl.u32 %v483_v29, %v180_v13  ;;  %v181_v40 = vshrl.u32 %v478_v15, %v180_v13  ;;  %vm199_vm5 = vcmp.lt.s32.totalorder %v178_v14, 3  ;;  %vm198_vm6 = vcmp.lt.s32.totalorder %v178_v14, 2 }
  0xe1   :  { %v184_v32 = vor.u32 %v183_v19, %v182_v16  ;;  %v187_v33 = vor.u32 %v186_v21, %v185_v18  ;;  %v190_v34 = vor.u32 %v189_v24, %v188_v22  ;;  %v193_v35 = vor.u32 %v192_v27, %v191_v25 }
  0xe2   :  { %v196_v36 = vor.u32 %v195_v30, %v194_v28 }
  0xe3   :  { %v202_v37 = vsel %vm200_vm4, %v190_v34, 2102212464  ;;  %v205_v38 = vsel %vm197_vm3, %v184_v32, %v187_v33  ;;  %v209_v39 = vsel %vm197_vm3, %v187_v33, %v190_v34  ;;  %v206_v41 = vsel %vm200_vm4, %v193_v35, 920167782 }
  0xe4   :  { %v210_v42 = vsel %vm200_vm4, %v196_v36, 1326507024  ;;  %v207_v43 = vsel %vm199_vm5, %v190_v34, %v206_v41  ;;  %v201_v46 = vsel %vm197_vm3, %v181_v40, %v184_v32  ;;  %v203_v47 = vsel %vm199_vm5, %v187_v33, %v202_v37 }
  0xe5   :  { %v211_v44 = vsel %vm199_vm5, %v193_v35, %v210_v42  ;;  %v208_v48 = vsel %vm198_vm6, %v205_v38, %v207_v43  ;;  %v204_v54 = vsel %vm198_vm6, %v201_v46, %v203_v47 }
  0xe6   :  { %v212_v49 = vsel %vm198_vm6, %v209_v39, %v211_v44  ;;  %v514_v52 = vmul.u32.u64.low %v213_v45, %v208_v48  ;;  %v515_v53 = vmul.u32.u64.high %v213_v45, %v208_v48, %v514_v52  ;;  %v220_v56 = vmul.u32 %v213_v45, %v204_v54 }
  0xe7   :  { %v511_v50 = vmul.u32.u64.low %v213_v45, %v212_v49  ;;  %v512_v51 = vmul.u32.u64.high %v213_v45, %v212_v49, %v511_v50 }
  0xe8   :  { %v223_v55 = vadd.s32 1, %v515_v53 }
  0xe9   :  { %vm222_vm7 = vc.u32 %v512_v51, %v514_v52  ;;  %v221_v5 = vadd.s32 %v514_v52, %v512_v51 }
  0xea   :  { %v224_v57 = vsel %vm222_vm7, %v223_v55, %v515_v53 }
  0xeb   :  { %v225_v58 = vadd.s32 %v224_v57, %v220_v56 }
  0xed   :  { %v226_v59 = vadd.s32 536870912, %v225_v58 }
  0xef   :  { %v227_v60 = vshrl.u32 %v226_v59, 30 }
  0xf1   :  { %v228_v61 = vshll.u32 %v227_v60, 30  ;;  %v251_v19 = vsub.s32 4, %v227_v60 }
  0xf3   :  { %v229_v62 = vsub.s32 %v225_v58, %v228_v61  ;;  %v252_v22 = vsel %vm167_vm9, %v251_v19, %v227_v60 }
  0xf4   :  { %v254_v23 = vsel %vm166_vm10, 0, %v252_v22 }
  0xf5   :  { %v231_v63 = vsub.s32 0, %v229_v62  ;;  %v258_v24 = vadd.s32 3, %v254_v23 }
  0xf7   :  { %v422_v0 = vmin.u32 %v231_v63, %v229_v62  ;;  %v259_v25 = vand.u32 3, %v258_v24 }
  0xf9   :  { %v233_v1 = vclz %v422_v0  ;;  %vm264_vm11 = vcmp.eq.s32.totalorder %v259_v25, 2  ;;  %vm261_vm12 = vcmp.eq.s32.totalorder %v259_v25, 0  ;;  %vm260_vm13 = vcmp.lt.s32.totalorder %v259_v25, 2 }
  0xfb   :  { %v423_v2 = vadd.s32 4294967294, %v233_v1 }
  0xfd   :  { %vm424_vm8 = vcmp.lt.s32.totalorder %v423_v2, 0 }
  0xfe   :  { %v236_v4 = vsel %vm424_vm8, 0, %v423_v2 }
  0xff   :  { %v237_v6 = vsub.s32 32, %v236_v4  ;;  %v241_v7 = vsub.s32 4294967266, %v236_v4  ;;  %v238_v8 = vshll.u32 %v229_v62, %v236_v4 }
 0x101   :  { %v239_v10 = vshrl.u32 %v221_v5, %v237_v6  ;;  %v242_v11 = vadd.s32 127, %v241_v7 }
 0x103   :  { %v240_v12 = vor.u32 %v239_v10, %v238_v8  ;;  %v243_v13 = vshll.u32 %v242_v11, 23 }
 0x105   :  { %v244_v14 = vor.u32 4788187, %v243_v13  ;;  %v247_v16 = vcvt.s32.f32 %v240_v12 }
 0x107   :  { %v245_v15 = vand.u32 2147483647, %v244_v14 }
 0x109   :  { %v248_v17 = vmul.f32 %v247_v16, %v245_v15 }
 0x10b   :  { %v249_v18 = vxor.u32 2147483648, %v248_v17 }
 0x10d   :  { %v250_v20 = vsel %vm167_vm9, %v249_v18, %v248_v17 }
 0x10e   :  { %v253_v21 = vsel %vm166_vm10, %v505_v3, %v250_v20 }
 0x10f   :  { %447 = vcosq.f32 %v253_v21 }
 0x110   :  { %449 = vsinq.f32 %v253_v21 }
 0x11c   :  { %v448_v26 = vpop.eup %447 }
 0x11d   :  { %v450_v27 = vpop.eup %449  ;;  %v265_v28 = vxor.u32 2147483648, %v448_v26 }
 0x11e   :  { %v262_v29 = vxor.u32 2147483648, %v450_v27 }
 0x11f   :  { %v266_v30 = vsel %vm264_vm11, %v265_v28, %v450_v27 }
 0x120   :  { %v263_v31 = vsel %vm261_vm12, %v448_v26, %v262_v29 }
 0x121   :  { %v267_v9 = vsel %vm260_vm13, %v263_v31, %v266_v30 }
 0x122   :  { %v268_v32 = vsel %vm257_vm14, nan, %v267_v9 }
 0x123   :  { %334 = vmatmul.mubr.f32.vlgmr.msra.gmra.mxu1 %v268_v32  ;;  %405 = vmatmul.mubr.f32.vlgmr.msra.gmra.mxu0 %v268_v32 }
 0x1e3   :  { %v335_v33 = vpop.f32.mrf.mxu1  ;;  %v406_v34 = vpop.f32.mrf.mxu0 }
 0x1e4   :  { %411 = vst [vmem:[%s540_s2] sm:$0xff] %v335_v33  ;;  %413 = vst [vmem:[%s540_s2 + $0x10] sm:$0xff] %v406_v34 }
 0x1e5   :  { %v337_v35 = vpop.f32.mrf.mxu1  ;;  %v408_v36 = vpop.f32.mrf.mxu0 }
 0x1e6   :  { %412 = vst [vmem:[%s540_s2 + $0x8] sm:$0xff] %v337_v35  ;;  %414 = vst [vmem:[%s540_s2 + $0x18] sm:$0xff] %v408_v36 }
 0x1e7   :  { %419 = vsyncpa [#allocation3], 1 }

</bundles_post_ra>
